<compile_context>
chip_gen: v7x
topology: tpu7x:2x2x1
jax: 0.10.0
libtpu: 0.0.40
codegen_flags: <defaults>
</compile_context>

<pallas_src>
import functools
import math

import jax
import jax.numpy as jnp
from jax import lax
from jax.experimental import pallas as pl
from jax.experimental.pallas import tpu as pltpu


# ---------------------------------------------------------------------------
# Path A (default): HBM table, manual per-row DMA gather into a double-
# buffered VMEM slab.  Scales to arbitrary vocab sizes; table never resident.
# ---------------------------------------------------------------------------
def _gather_kernel(tok_ref, tab_hbm, out_ref, slab, sem, *,
                   scale, rows, chunk, vocab, n_tok):
    # tok_ref : (N,) int32 in SMEM (scalar prefetch)
    # tab_hbm : (V, E) table ref in HBM (memory_space=pl.ANY)
    # out_ref : (rows, E) output block in VMEM
    # slab    : (2, chunk, E) VMEM scratch (double buffer)
    # sem     : (2, chunk) DMA semaphores
    step = pl.program_id(0)
    base = step * rows
    nchunks = rows // chunk  # static

    def issue(chunk_idx, slot):
        # Start `chunk` per-row DMAs HBM -> slab[slot].
        def body(g, carry):
            flat = jnp.minimum(base + chunk_idx * chunk + g, n_tok - 1)
            tok = tok_ref[flat]
            tok = jnp.minimum(jnp.maximum(tok, 0), vocab - 1)  # free scalar clamp
            pltpu.make_async_copy(tab_hbm.at[tok], slab.at[slot, g],
                                  sem.at[slot, g]).start()
            return carry
        lax.fori_loop(0, chunk, body, 0)

    def wait_chunk(slot):
        def body(g, carry):
            pltpu.make_async_copy(tab_hbm.at[0], slab.at[slot, g],
                                  sem.at[slot, g]).wait()
            return carry
        lax.fori_loop(0, chunk, body, 0)

    # Prime the pipeline with chunk 0 of this step.
    issue(0, 0)

    def chunk_loop(j, carry):
        slot = j % 2

        @pl.when(j + 1 < nchunks)
        def _():
            issue(j + 1, 1 - slot)  # prefetch next chunk while this one lands

        wait_chunk(slot)
        off = pl.multiple_of(j * chunk, chunk)
        # Single lane-dense scaled slab store (fused lookup * sqrt(E)).
        out_ref[pl.ds(off, chunk), :] = (
            slab[slot].astype(jnp.float32) * scale).astype(out_ref.dtype)
        return carry

    lax.fori_loop(0, nchunks, chunk_loop, 0)


# ---------------------------------------------------------------------------
# Path B (small tables): table resident in VMEM, gather rows with dynamic
# sublane slices; no per-row HBM DMA descriptors.
# ---------------------------------------------------------------------------
def _resident_kernel(tok_ref, tab_ref, out_ref, slab, *,
                     scale, rows, vocab, n_tok):
    # tab_ref : (V, E) table in VMEM (loaded once; constant index_map)
    # slab    : (rows, E) VMEM staging slab
    step = pl.program_id(0)
    base = step * rows

    def body(g, carry):
        flat = jnp.minimum(base + g, n_tok - 1)
        tok = tok_ref[flat]
        tok = jnp.minimum(jnp.maximum(tok, 0), vocab - 1)
        slab[pl.ds(g, 1), :] = tab_ref[pl.ds(tok, 1), :]
        return carry

    lax.fori_loop(0, rows, body, 0)
    # One scaled, unmasked (rows, E) store; scale applied once per slab.
    out_ref[...] = (slab[...].astype(jnp.float32) * scale).astype(out_ref.dtype)


def _plan(n_tokens, emb, itemsize, *, chunk_bytes=64 << 10, step_bytes=512 << 10):
    """Pick (rows_per_step, rows_per_chunk)."""
    row_bytes = emb * itemsize
    # rows per DMA chunk (inner double-buffered unit): multiple of 8, <= 128
    # (bounds the per-chunk semaphore count).
    c = (chunk_bytes // row_bytes) // 8 * 8
    c = max(8, min(128, c))
    # rows per grid step: multiple of c, ~step_bytes of output per step.
    k = max(1, step_bytes // (c * row_bytes))
    g = c * k
    # Prefer a rows_per_step that divides n_tokens (avoids padded output +
    # the extra out[:N] copy in XLA).
    m = g
    while m >= c:
        if n_tokens % m == 0:
            return m, c
        m -= c
    if g > n_tokens:
        g = max(c, ((n_tokens + c - 1) // c) * c)
    return g, c


def token_embedding(tokens, table, *, resident_table_bytes=8 << 20, path=None,
                    chunk_bytes=64 << 10, step_bytes=512 << 10):
    """Pallas equivalent of: nn.Embedding(V, E)(tokens.long()) * sqrt(E).

    path: None (auto), "gather" (HBM DMA gather), or "resident" (table in VMEM).
    """
    V, E = table.shape
    if E % 128 != 0:
        raise ValueError(f"emb_size must be a multiple of 128 lanes, got {E}")
    lead_shape = tuple(tokens.shape)
    N = math.prod(lead_shape)
    if N > (1 << 18):
        # TODO(synk): chunk the call (outer split over tokens) for >256K tokens;
        # the 1-D scalar-prefetch buffer pads to next_pow2(4*N) bytes of SMEM.
        raise ValueError(f"too many tokens ({N}) for a single scalar-prefetch call")

    itemsize = jnp.dtype(table.dtype).itemsize
    scale = math.sqrt(E)
    g, c = _plan(N, E, itemsize, chunk_bytes=chunk_bytes, step_bytes=step_bytes)
    n_padded = N + ((-N) % g)
    grid = (n_padded // g,)

    tok_flat = tokens.reshape(-1).astype(jnp.int32)   # ids -> SMEM via prefetch

    table_bytes = V * E * itemsize
    use_resident = (path == "resident") or (
        path is None and table_bytes <= resident_table_bytes)

    if use_resident:
        kernel = functools.partial(_resident_kernel, scale=scale, rows=g,
                                   vocab=V, n_tok=N)
        in_specs = [pl.BlockSpec((V, E), lambda i, tok: (0, 0))]  # loaded once
        scratch_shapes = [pltpu.VMEM((g, E), table.dtype)]
        vmem_est = 2 * table_bytes + 3 * g * E * itemsize + (2 << 20)
    else:
        kernel = functools.partial(_gather_kernel, scale=scale, rows=g, chunk=c,
                                   vocab=V, n_tok=N)
        in_specs = [pl.BlockSpec(memory_space=pl.ANY)]            # table stays in HBM
        scratch_shapes = [pltpu.VMEM((2, c, E), table.dtype),
                          pltpu.SemaphoreType.DMA((2, c))]
        vmem_est = 2 * c * E * itemsize + 2 * g * E * itemsize + (2 << 20)

    vmem_limit = int(min(32 << 20, max(16 << 20, vmem_est)))

    out = pl.pallas_call(
        kernel,
        out_shape=jax.ShapeDtypeStruct((n_padded, E), table.dtype),
        grid_spec=pltpu.PrefetchScalarGridSpec(
            num_scalar_prefetch=1,                  # token ids -> SMEM
            grid=grid,
            in_specs=in_specs,
            out_specs=pl.BlockSpec((g, E), lambda i, tok: (i, 0)),
            scratch_shapes=scratch_shapes,
        ),
        compiler_params=pltpu.CompilerParams(
            dimension_semantics=("parallel",),      # token blocks split across TCs
            vmem_limit_bytes=vmem_limit,
        ),
    )(tok_flat, table)

    if n_padded != N:                               # rare fallback when g doesn't divide N
        out = out[:N]
    return out.reshape(*lead_shape, E)


if __name__ == "__main__":
    VOCAB_SIZE = 256
    EMB_SIZE = 128
    BATCH = 2
    SEQ = 128

    key = jax.random.PRNGKey(0)
    k_emb, k_tok = jax.random.split(key)

    # nn.Embedding default init: weight ~ N(0, 1)
    emb_table = jax.random.normal(k_emb, (VOCAB_SIZE, EMB_SIZE), dtype=jnp.float32)
    tokens = jax.random.randint(k_tok, (BATCH, SEQ), 0, VOCAB_SIZE, dtype=jnp.int32)

    ref = jnp.take(emb_table, tokens, axis=0) * math.sqrt(EMB_SIZE)

    # Exercise both code paths: the VMEM-resident fast path (auto-selected at
    # this table size) and the HBM manual-DMA gather path (the large-table default).
    out_resident = jax.block_until_ready(
        token_embedding(tokens, emb_table, path="resident"))
    out_gather = jax.block_until_ready(
        token_embedding(tokens, emb_table, path="gather"))

    assert out_resident.shape == (BATCH, SEQ, EMB_SIZE)
    assert out_resident.dtype == jnp.float32
    assert jnp.allclose(out_resident, ref, atol=1e-5, rtol=1e-5)
    assert out_gather.shape == (BATCH, SEQ, EMB_SIZE)
    assert jnp.allclose(out_gather, ref, atol=1e-5, rtol=1e-5)

    print("KERNEL_OK")
</pallas_src>

<mosaic_0001>
module attributes {stable_mosaic.version = 11 : i64} {
  func.func @_resident_kernel(%arg0: i32, %arg1: memref<256xi32, #tpu.memory_space<smem>>, %arg2: memref<256x128xf32, #tpu.memory_space<vmem>>, %arg3: memref<256x128xf32, #tpu.memory_space<vmem>>, %arg4: memref<256x128xf32, #tpu.memory_space<vmem>>) attributes {dimension_semantics = [#tpu.dimension_semantics<parallel>], iteration_bounds = array<i64: 1>, scalar_prefetch = 1 : i64, scratch_operands = 1 : i64, tpu.core_type = #tpu.core_type<tc>, window_params = [{pipeline_mode = #tpu.pipeline_mode<synchronous>, transform_indices = @transform_0, window_bounds = array<i64: 256, 128>}, {transform_indices = @transform_1, window_bounds = array<i64: 256, 128>}]} {
    %c256_i32 = arith.constant 256 : i32
    %0 = arith.muli %arg0, %c256_i32 : i32
    %c0_i32 = arith.constant 0 : i32
    %c256_i32_0 = arith.constant 256 : i32
    %1 = arith.addi %c0_i32, %c256_i32_0 : i32
    %c1_i32 = arith.constant 1 : i32
    scf.for %arg5 = %c0_i32 to %1 step %c1_i32  : i32 {
      %6 = arith.addi %0, %arg5 : i32
      %c255_i32 = arith.constant 255 : i32
      %7 = arith.minsi %6, %c255_i32 : i32
      %8 = arith.index_cast %7 : i32 to index
      %9 = memref.load %arg1[%8] : memref<256xi32, #tpu.memory_space<smem>>
      %c0_i32_5 = arith.constant 0 : i32
      %10 = arith.maxsi %9, %c0_i32_5 : i32
      %c255_i32_6 = arith.constant 255 : i32
      %11 = arith.minsi %10, %c255_i32_6 : i32
      %12 = arith.index_cast %11 : i32 to index
      %c0_7 = arith.constant 0 : index
      %13 = vector.load %arg2[%12, %c0_7] : memref<256x128xf32, #tpu.memory_space<vmem>>, vector<1x128xf32>
      %14 = arith.index_cast %arg5 : i32 to index
      %c0_8 = arith.constant 0 : index
      %15 = vector.load %arg4[%14, %c0_8] : memref<256x128xf32, #tpu.memory_space<vmem>>, vector<1x128xf32>
      tpu.vector_store %arg4[%14, %c0_8], %13 {strides = array<i32>} : memref<256x128xf32, #tpu.memory_space<vmem>>, vector<1x128xf32>,
    }
    %c256_i32_1 = arith.constant 256 : i32
    %c0 = arith.constant 0 : index
    %c0_2 = arith.constant 0 : index
    %2 = vector.load %arg4[%c0, %c0_2] : memref<256x128xf32, #tpu.memory_space<vmem>>, vector<256x128xf32>
    %cst = arith.constant 11.3137083 : f32
    %3 = vector.broadcast %cst : f32 to vector<256x128xf32>
    %4 = arith.mulf %2, %3 : vector<256x128xf32>
    %c0_3 = arith.constant 0 : index
    %c0_4 = arith.constant 0 : index
    %5 = vector.load %arg3[%c0_3, %c0_4] : memref<256x128xf32, #tpu.memory_space<vmem>>, vector<256x128xf32>
    tpu.vector_store %arg3[%c0_3, %c0_4], %4 {strides = array<i32>} : memref<256x128xf32, #tpu.memory_space<vmem>>, vector<256x128xf32>,
    return
  }
  func.func @transform_0(%arg0: i32, %arg1: memref<256xi32, #tpu.memory_space<smem>>) -> (i32, i32) {
    %c0_i32 = arith.constant 0 : i32
    %c0_i32_0 = arith.constant 0 : i32
    %c0_i32_1 = arith.constant 0 : i32
    return %c0_i32, %c0_i32_0 : i32, i32
  }
  func.func @transform_1(%arg0: i32, %arg1: memref<256xi32, #tpu.memory_space<smem>>) -> (i32, i32) {
    %c0_i32 = arith.constant 0 : i32
    %c0_i32_0 = arith.constant 0 : i32
    return %arg0, %c0_i32 : i32, i32
  }
}

</mosaic_0001>

<bundles_post_ra>
// kernel: tpu_custom_call.1
= control target key start
LH: loop header
LB: loop body
LE: loop exit
PB: predicated region body
PF: predicated region fallthrough
CT: control target
= control target key end

     0   :  { %s317_s0 = inlined_call_operand.hbm [shape: s32[256], index: 0, kind: input, shape index: {}]   ;;  %s318_s1 = inlined_call_operand.hbm [shape: f32[256,128], index: 1, kind: input, shape index: {}]   ;;  %s319_s2 = inlined_call_operand.hbm [shape: f32[256,128], index: 2, kind: output, shape index: {}]  }
   0x1   :  { %s187_s11 = scalar_lea.hbm %s317_s0, 32 }
   0x2   :  { %p188_p0 = scmp.ne.s32.totalorder %s317_s0, %s187_s11  ;;  %p191_p1 = scmp.lt.u32.totalorder %s187_s11, %s317_s0 }
   0x4   :  { %p193_p2 = pnand %p191_p1, %p188_p0 }
   0x6   :  { %196 = shalt.err (!%p193_p2)  }
   0x7   :  { %s255_s16 = smov [#allocation4]  }
   0x8   :  { %8 = dma.hbm_to_smem %s317_s0, 32, %s255_s16, [#allocation3] }
   0x9   :  { %245 = dma.done.wait [#allocation3], 32 }
   0xa   :  { %246 = vsyncadd [#allocation3], 4294967264 }
   0xb   :  { %10 = sfence }
   0xc   :  { %11 = vsyncpa [#allocation6], 0 }
   0xd   :  { %12 = vsyncpa [#allocation7], 0  ;;  %s256_s19 = smov [#allocation5]   ;;  %s197_s23 = scalar_lea.hbm %s318_s1, 4096 }
   0xe   :  { %s18_s20 = sshll.u32 %s256_s19, 4  ;;  %p198_p3 = scmp.ne.s32.totalorder %s318_s1, %s197_s23  ;;  %s19_s20 = int_to_ptr.vmem [resolvable:$true] %s18_s20 }
   0xf   :  { %p201_p4 = scmp.lt.u32.totalorder %s197_s23, %s318_s1 }
  0x11   :  { %p203_p5 = pnand %p201_p4, %p198_p3 }
  0x13   :  { %206 = shalt.err (!%p203_p5)
}
  0x14   :  { %s207_s0 = scalar_lea.vmem %s19_s20, 4096  ;;  %p212_p7 = scmp.lt.s32.totalorder %s19_s20, %s19_s20 }
  0x15   :  { %p208_p6 = scmp.ne.s32.totalorder %s19_s20, %s207_s0  ;;  %p213_p8 = scmp.lt.s32.totalorder %s207_s0, %s207_s0 }
  0x17   :  { %p214_p9 = por %p213_p8, %p212_p7 }
  0x19   :  { %p215_p10 = pnand %p214_p9, %p208_p6 }
  0x1b   :  { %218 = shalt.err (!%p215_p10)
}
  0x1c   :  { %s257_s28 = smov 128   ;;  %s258_s29 = smov 8  }
  0x1d   :  { %24 = dma.hbm_to_vmem [thread:$0]  %s318_s1, 4096, %s19_s20, [#allocation6], %s257_s28, %s257_s28, %s258_s29  }
  0x1e   :  { %247 = dma.done.wait [#allocation6], 4096  }
  0x1f   :  { %248 = vsyncadd [#allocation6], 4294963200  ;;  %s251_s4 = smov 0  }
  0x20 LB: > { %p36_p11 = scmp.lt.s32.totalorder %s253_s4, 255  ;;  %s45_s8 = scalar_lea.vmem [#allocation2], %s253_s4  ;;  %s253_s4 = sphi %s251_s4, %s34_s4  }
  0x22   : > { %s37_s5 = scalar_select %p36_p11, %s253_s4, 255 }
  0x23   : > { %s34_s4 = sadd.s32 1, %s253_s4  }
  0x24   : > { %s38_s6 = sld [smem:[#allocation4 + %s37_s5]]  ;;  %p31_p0 = scmp.ge.s32.totalorder %s34_s4, 256  }
  0x25   :  { %s259_s1 = smov (%p31_p0), [#allocation8]  }
  0x26   :  { %s148_s9 = sshll.u32 (%p31_p0), %s259_s1, 4  ;;  %s149_s9 = int_to_ptr.vmem [resolvable:$true] %s148_s9 }
  0x27   :  { %s219_s10 = scalar_lea.vmem (%p31_p0), %s149_s9, 4096  ;;  %p224_p2 = scmp.lt.s32.totalorder (%p31_p0), %s149_s9, %s149_s9 }
  0x28   :  { %p220_p1 = scmp.ne.s32.totalorder (%p31_p0), %s149_s9, %s219_s10  ;;  %p225_p3 = scmp.lt.s32.totalorder (%p31_p0), %s219_s10, %s219_s10 }
  0x2a   : > { %p39_p12 = scmp.gt.s32.totalorder %s38_s6, 0  ;;  %p167_p13 = scmp.lt.s32.totalorder %s38_s6, 255 }
  0x2b   :  { %33 = sbr.rel (!%p31_p0) target bundleno = 32 (0x20), region = 37  ;;  %p226_p4 = por (%p31_p0), %p225_p3, %p224_p2 }
  0x2c   : > { %s321_s6 = smov (!%p39_p12, %s38_s6), 0 }
  0x2d   : > { %s323_s6 = smov (!%p167_p13, %s321_s6), 255  ;;  %p227_p5 = pnand (%p31_p0), %p226_p4, %p220_p1 }
  0x2e   : > { %s43_s7 = scalar_lea.vmem [#allocation5], %s323_s6 }
  0x2f   : > { %v44_v0 = vld [vmem:[%s43_s7] sm:$0x1] }
  0x30   : > { %46 = vst [vmem:[%s45_s8] sm:$0x1] %v44_v0 }
  0x37   :  { %v47_v1 = vld [vmem:[#allocation2] sm:$0xff]  ;;  %v48_v2 = vld [vmem:[#allocation2 + $0x8] sm:$0xff]  ;;  %v49_v3 = vld [vmem:[#allocation2 + $0x10] sm:$0xff] }
  0x38   :  { %v79_v4 = vmul.f32 11.313708, %v47_v1  ;;  %v80_v5 = vmul.f32 11.313708, %v48_v2  ;;  %v81_v6 = vmul.f32 11.313708, %v49_v3 }
  0x39   :  { %v50_v7 = vld [vmem:[#allocation2 + $0x18] sm:$0xff]  ;;  %v51_v8 = vld [vmem:[#allocation2 + $0x20] sm:$0xff]  ;;  %v52_v9 = vld [vmem:[#allocation2 + $0x28] sm:$0xff] }
  0x3a   :  { %111 = vst [vmem:[#allocation8] sm:$0xff] %v79_v4  ;;  %112 = vst [vmem:[#allocation8 + $0x8] sm:$0xff] %v80_v5  ;;  %v82_v10 = vmul.f32 11.313708, %v50_v7  ;;  %v83_v11 = vmul.f32 11.313708, %v51_v8 }
  0x3b   :  { %113 = vst [vmem:[#allocation8 + $0x10] sm:$0xff] %v81_v6  ;;  %v84_v12 = vmul.f32 11.313708, %v52_v9  ;;  %v53_v13 = vld [vmem:[#allocation2 + $0x30] sm:$0xff]  ;;  %v54_v14 = vld [vmem:[#allocation2 + $0x38] sm:$0xff]  ;;  %v55_v15 = vld [vmem:[#allocation2 + $0x40] sm:$0xff] }
  0x3c   :  { %114 = vst [vmem:[#allocation8 + $0x18] sm:$0xff] %v82_v10  ;;  %115 = vst [vmem:[#allocation8 + $0x20] sm:$0xff] %v83_v11  ;;  %v85_v16 = vmul.f32 11.313708, %v53_v13  ;;  %v86_v17 = vmul.f32 11.313708, %v54_v14 }
  0x3d   :  { %116 = vst [vmem:[#allocation8 + $0x28] sm:$0xff] %v84_v12  ;;  %v87_v18 = vmul.f32 11.313708, %v55_v15  ;;  %v56_v19 = vld [vmem:[#allocation2 + $0x48] sm:$0xff]  ;;  %v57_v20 = vld [vmem:[#allocation2 + $0x50] sm:$0xff]  ;;  %v58_v21 = vld [vmem:[#allocation2 + $0x58] sm:$0xff] }
  0x3e   :  { %117 = vst [vmem:[#allocation8 + $0x30] sm:$0xff] %v85_v16  ;;  %118 = vst [vmem:[#allocation8 + $0x38] sm:$0xff] %v86_v17  ;;  %v88_v22 = vmul.f32 11.313708, %v56_v19  ;;  %v89_v23 = vmul.f32 11.313708, %v57_v20 }
  0x3f   :  { %119 = vst [vmem:[#allocation8 + $0x40] sm:$0xff] %v87_v18  ;;  %v90_v24 = vmul.f32 11.313708, %v58_v21  ;;  %v59_v25 = vld [vmem:[#allocation2 + $0x60] sm:$0xff]  ;;  %v60_v26 = vld [vmem:[#allocation2 + $0x68] sm:$0xff]  ;;  %v61_v27 = vld [vmem:[#allocation2 + $0x70] sm:$0xff] }
  0x40   :  { %120 = vst [vmem:[#allocation8 + $0x48] sm:$0xff] %v88_v22  ;;  %121 = vst [vmem:[#allocation8 + $0x50] sm:$0xff] %v89_v23  ;;  %v91_v28 = vmul.f32 11.313708, %v59_v25  ;;  %v92_v29 = vmul.f32 11.313708, %v60_v26 }
  0x41   :  { %122 = vst [vmem:[#allocation8 + $0x58] sm:$0xff] %v90_v24  ;;  %v93_v30 = vmul.f32 11.313708, %v61_v27  ;;  %v62_v31 = vld [vmem:[#allocation2 + $0x78] sm:$0xff]  ;;  %v63_v32 = vld [vmem:[#allocation2 + $0x80] sm:$0xff]  ;;  %v64_v33 = vld [vmem:[#allocation2 + $0x88] sm:$0xff] }
  0x42   :  { %123 = vst [vmem:[#allocation8 + $0x60] sm:$0xff] %v91_v28  ;;  %124 = vst [vmem:[#allocation8 + $0x68] sm:$0xff] %v92_v29  ;;  %v94_v34 = vmul.f32 11.313708, %v62_v31  ;;  %v95_v35 = vmul.f32 11.313708, %v63_v32 }
  0x43   :  { %125 = vst [vmem:[#allocation8 + $0x70] sm:$0xff] %v93_v30  ;;  %v96_v36 = vmul.f32 11.313708, %v64_v33  ;;  %v65_v37 = vld [vmem:[#allocation2 + $0x90] sm:$0xff]  ;;  %v66_v38 = vld [vmem:[#allocation2 + $0x98] sm:$0xff]  ;;  %v67_v39 = vld [vmem:[#allocation2 + $0xa0] sm:$0xff] }
  0x44   :  { %126 = vst [vmem:[#allocation8 + $0x78] sm:$0xff] %v94_v34  ;;  %127 = vst [vmem:[#allocation8 + $0x80] sm:$0xff] %v95_v35  ;;  %v97_v40 = vmul.f32 11.313708, %v65_v37  ;;  %v98_v41 = vmul.f32 11.313708, %v66_v38 }
  0x45   :  { %128 = vst [vmem:[#allocation8 + $0x88] sm:$0xff] %v96_v36  ;;  %v99_v42 = vmul.f32 11.313708, %v67_v39  ;;  %v68_v43 = vld [vmem:[#allocation2 + $0xa8] sm:$0xff]  ;;  %v69_v44 = vld [vmem:[#allocation2 + $0xb0] sm:$0xff]  ;;  %v70_v45 = vld [vmem:[#allocation2 + $0xb8] sm:$0xff] }
  0x46   :  { %129 = vst [vmem:[#allocation8 + $0x90] sm:$0xff] %v97_v40  ;;  %130 = vst [vmem:[#allocation8 + $0x98] sm:$0xff] %v98_v41  ;;  %v100_v46 = vmul.f32 11.313708, %v68_v43  ;;  %v101_v47 = vmul.f32 11.313708, %v69_v44 }
  0x47   :  { %131 = vst [vmem:[#allocation8 + $0xa0] sm:$0xff] %v99_v42  ;;  %v102_v48 = vmul.f32 11.313708, %v70_v45  ;;  %v71_v49 = vld [vmem:[#allocation2 + $0xc0] sm:$0xff]  ;;  %v72_v50 = vld [vmem:[#allocation2 + $0xc8] sm:$0xff]  ;;  %v73_v51 = vld [vmem:[#allocation2 + $0xd0] sm:$0xff] }
  0x48   :  { %132 = vst [vmem:[#allocation8 + $0xa8] sm:$0xff] %v100_v46  ;;  %133 = vst [vmem:[#allocation8 + $0xb0] sm:$0xff] %v101_v47  ;;  %v103_v52 = vmul.f32 11.313708, %v71_v49  ;;  %v104_v53 = vmul.f32 11.313708, %v72_v50 }
  0x49   :  { %134 = vst [vmem:[#allocation8 + $0xb8] sm:$0xff] %v102_v48  ;;  %v105_v54 = vmul.f32 11.313708, %v73_v51  ;;  %v74_v55 = vld [vmem:[#allocation2 + $0xd8] sm:$0xff]  ;;  %v75_v56 = vld [vmem:[#allocation2 + $0xe0] sm:$0xff]  ;;  %v76_v57 = vld [vmem:[#allocation2 + $0xe8] sm:$0xff] }
  0x4a   :  { %135 = vst [vmem:[#allocation8 + $0xc0] sm:$0xff] %v103_v52  ;;  %136 = vst [vmem:[#allocation8 + $0xc8] sm:$0xff] %v104_v53  ;;  %v106_v58 = vmul.f32 11.313708, %v74_v55  ;;  %v107_v59 = vmul.f32 11.313708, %v75_v56 }
  0x4b   :  { %137 = vst [vmem:[#allocation8 + $0xd0] sm:$0xff] %v105_v54  ;;  %v108_v60 = vmul.f32 11.313708, %v76_v57  ;;  %v77_v61 = vld [vmem:[#allocation2 + $0xf0] sm:$0xff]  ;;  %v78_v62 = vld [vmem:[#allocation2 + $0xf8] sm:$0xff] }
  0x4c   :  { %138 = vst [vmem:[#allocation8 + $0xd8] sm:$0xff] %v106_v58  ;;  %139 = vst [vmem:[#allocation8 + $0xe0] sm:$0xff] %v107_v59  ;;  %v109_v63 = vmul.f32 11.313708, %v77_v61  ;;  %v110_v0 = vmul.f32 11.313708, %v78_v62 }
  0x4d   :  { %140 = vst [vmem:[#allocation8 + $0xe8] sm:$0xff] %v108_v60 }
  0x4e   :  { %141 = vst [vmem:[#allocation8 + $0xf0] sm:$0xff] %v109_v63  ;;  %142 = vst [vmem:[#allocation8 + $0xf8] sm:$0xff] %v110_v0 }
  0x4f   :  { %230 = shalt.err (!%p227_p5)
}
  0x50   :  { %s231_s13 = scalar_lea.hbm %s319_s2, 4096 }
  0x51   :  { %p232_p6 = scmp.ne.s32.totalorder %s319_s2, %s231_s13  ;;  %p235_p7 = scmp.lt.u32.totalorder %s231_s13, %s319_s2 }
  0x53   :  { %p237_p8 = pnand %p235_p7, %p232_p6 }
  0x55   :  { %240 = shalt.err (!%p237_p8)
}
  0x56   :  { %154 = dma.vmem_to_hbm [thread:$0]  %s149_s9, 4096, %s319_s2, [#allocation7], %s257_s28, %s257_s28, %s258_s29  }
  0x57   :  { %249 = dma.done.wait [#allocation7], 4096  }
  0x58   :  { %250 = vsyncadd [#allocation7], 4294963200 }
  0x59   :  { %158 = vsyncpa [#allocation6], 1 }
  0x5a   :  { %159 = vsyncpa [#allocation7], 1 }

</bundles_post_ra>
